<compile_context>
chip_gen: v6e
topology: v6e:2x2x1
jax: 0.10.0
libtpu: 0.0.40
codegen_flags: <defaults>
</compile_context>

<pallas_src>
import functools

import jax
import jax.numpy as jnp
from jax import lax
from jax.experimental import pallas as pl
from jax.experimental.pallas import tpu as pltpu


def _round_up(x, m):
    return ((x + m - 1) // m) * m


def _reward_criterion_kernel(inp_ref, seq_ref, rew_ref,       # inputs
                             num_ref, den_ref,                 # outputs
                             acc_ref, cnt_ref,                 # VMEM scratch
                             *, B, T):
    i = pl.program_id(0)          # B-tile index (parallel)
    j = pl.program_id(1)          # T-tile index (reduction)
    n_t = pl.num_programs(1)

    TB, TT = inp_ref.shape        # block shape (TT is a multiple of 128)
    G = TT // 128                 # lane groups per tile

    @pl.when(j == 0)
    def _init():
        acc_ref[...] = jnp.zeros_like(acc_ref)
        cnt_ref[...] = jnp.zeros_like(cnt_ref)

    inp = inp_ref[...].astype(jnp.float32)
    rew = rew_ref[...].astype(jnp.float32)
    pos = (seq_ref[...] > 0).astype(jnp.float32)

    prod = inp * rew              # negation deferred to finalize

    def lane_group_sum(x):
        # (TB, TT) -> (TB, 128): 128-aligned static lane slices + VALU adds.
        out = x[:, 0:128]
        for g in range(1, G):
            out = out + x[:, g * 128:(g + 1) * 128]
        return out

    need_col_mask = (T % TT) != 0      # trace-time constants
    need_row_mask = (B % TB) != 0

    # ---- Interior T-tiles: no iota, no masking (fast path). ----
    @pl.when(j < n_t - 1)
    def _interior():
        acc_ref[...] += lane_group_sum(prod)
        cnt_ref[...] += lane_group_sum(pos)

    # ---- Last T-tile: column masking + per-B-tile finalize. ----
    @pl.when(j == n_t - 1)
    def _last():
        col = j * TT + lax.broadcasted_iota(jnp.int32, (TB, TT), 1)
        # Shifted-mask count: global columns 0..T-2 only (the all-ones first
        # mask column is added once per row as `rows_here` below).
        cnt_tile = jnp.where(col < (T - 1), pos, 0.0)
        if need_col_mask:
            prod_tile = jnp.where(col < T, prod, 0.0)   # zero tile-padding cols
        else:
            prod_tile = prod
        acc = acc_ref[...] + lane_group_sum(prod_tile)
        cnt = cnt_ref[...] + lane_group_sum(cnt_tile)

        # Tile-padding rows (only possible on the last B-tile) are zeroed here,
        # on the small (TB, 128) accumulators, instead of per element.
        if need_row_mask:
            row = i * TB + lax.broadcasted_iota(jnp.int32, (TB, 128), 0)
            rvalid = row < B
            acc = jnp.where(rvalid, acc, 0.0)
            cnt = jnp.where(rvalid, cnt, 0.0)

        rows_here = jnp.minimum(B - i * TB, TB).astype(jnp.float32)
        p_num = -jnp.sum(acc)                 # single negation per B-tile
        p_den = jnp.sum(cnt) + rows_here      # "+1" per valid row (first column)

        # Lane-dense (8,128)-aligned output blocks (no masked partial stores).
        num_ref[...] = jnp.full(num_ref.shape, p_num, jnp.float32)
        den_ref[...] = jnp.full(den_ref.shape, p_den, jnp.float32)


def reward_criterion(inp, seq, reward, *, block_b=None, block_t=None):
    """Pallas implementation of RewardCriterion.forward."""
    B, T = seq.shape
    inp = jnp.reshape(inp, (B, T))
    reward = jnp.reshape(reward, (B, T))
    # seq is passed in its native dtype; (seq > 0) happens in-kernel.

    # Sublane alignment follows the narrowest streamed dtype
    # ((8,128) f32/i32, (16,128) bf16/i16, (32,128) i8).
    min_item = min(inp.dtype.itemsize, reward.dtype.itemsize, seq.dtype.itemsize)
    sub_align = max(8, 32 // max(int(min_item), 1))

    # block_t: multiple of 128 (required by the in-kernel lane-group reduce);
    # large tiles amortize the ~0.35 us per-grid-step overhead.
    if block_t is None:
        block_t = min(_round_up(T, 128), 2048)
    else:
        block_t = _round_up(min(block_t, T), 128)

    # block_b: default gives >=2 B-tiles when possible (dual-TC megacore on
    # v7x), capped so double-buffered input tiles stay comfortably in VMEM.
    if block_b is None:
        if B >= 2 * sub_align:
            block_b = min(_round_up(pl.cdiv(B, 2), sub_align), 512)
        else:
            block_b = _round_up(B, sub_align)
    block_b = _round_up(block_b, 8)

    n_b = pl.cdiv(B, block_b)
    n_t = pl.cdiv(T, block_t)

    # Explicit scoped-VMEM limit: double-buffered inputs + small scratch + slack
    # (v5e's 16 MiB default scoped limit would otherwise cap the tile size).
    in_bytes = block_b * block_t * (inp.dtype.itemsize
                                    + seq.dtype.itemsize
                                    + reward.dtype.itemsize)
    scratch_bytes = 2 * block_b * 128 * 4
    vmem_limit = int(min(max(2 * in_bytes + scratch_bytes + (4 << 20), 16 << 20),
                         56 << 20))

    kernel = functools.partial(_reward_criterion_kernel, B=B, T=T)

    num, den = pl.pallas_call(
        kernel,
        grid=(n_b, n_t),
        in_specs=[
            pl.BlockSpec((block_b, block_t), lambda i, j: (i, j)),
            pl.BlockSpec((block_b, block_t), lambda i, j: (i, j)),
            pl.BlockSpec((block_b, block_t), lambda i, j: (i, j)),
        ],
        out_specs=[
            pl.BlockSpec((1, 8, 128), lambda i, j: (i, 0, 0)),
            pl.BlockSpec((1, 8, 128), lambda i, j: (i, 0, 0)),
        ],
        out_shape=[
            jax.ShapeDtypeStruct((n_b, 8, 128), jnp.float32),
            jax.ShapeDtypeStruct((n_b, 8, 128), jnp.float32),
        ],
        scratch_shapes=[
            pltpu.VMEM((block_b, 128), jnp.float32),   # numerator accumulator
            pltpu.VMEM((block_b, 128), jnp.float32),   # mask-count accumulator
        ],
        compiler_params=pltpu.CompilerParams(
            dimension_semantics=("parallel", "arbitrary"),
            vmem_limit_bytes=vmem_limit),
    )(inp, seq, reward)

    # Tiny combine + divide in the wrapper (full f32 precision).
    total_num = jnp.sum(num[:, 0, 0])
    total_den = jnp.sum(den[:, 0, 0])
    return total_num / total_den


def _reference(inp, seq, reward):
    """Pure-JAX reference mirroring the PyTorch module."""
    B, T = seq.shape
    inp = jnp.reshape(inp, (-1,)).astype(jnp.float32)
    reward = jnp.reshape(reward, (-1,)).astype(jnp.float32)
    mask = (seq > 0).astype(jnp.float32)
    mask = jnp.concatenate(
        [jnp.ones((B, 1), jnp.float32), mask[:, :-1]], axis=1
    ).reshape(-1)
    out = -inp * reward
    return jnp.sum(out) / jnp.sum(mask)


if __name__ == "__main__":
    key = jax.random.PRNGKey(0)
    keys = jax.random.split(key, 9)

    # --- Test 1: small canonical shape (single padded block, both edge masks). ---
    B, T = 2, 8
    inp = jax.random.normal(keys[0], (B, T), dtype=jnp.float32)       # log-probs
    seq = jax.random.randint(keys[1], (B, T), 0, 5, dtype=jnp.int32)  # 0 = pad
    rew = jax.random.normal(keys[2], (B, T), dtype=jnp.float32)

    out = reward_criterion(inp, seq, rew)
    jax.block_until_ready(out)
    ref = _reference(inp, seq, rew)
    assert jnp.allclose(out, ref, atol=1e-5, rtol=1e-5), (out, ref)

    # --- Test 2: bf16 inputs + non-divisible shape: multi-tile grid exercising
    #             the interior fast path, last-tile masking and in-kernel upcast. ---
    B2, T2 = 10, 200
    inp2 = jax.random.normal(keys[3], (B2, T2), dtype=jnp.bfloat16)
    seq2 = jax.random.randint(keys[4], (B2, T2), 0, 5, dtype=jnp.int32)
    rew2 = jax.random.normal(keys[5], (B2, T2), dtype=jnp.bfloat16)

    out2 = reward_criterion(inp2, seq2, rew2, block_b=8, block_t=128)
    jax.block_until_ready(out2)
    ref2 = _reference(inp2, seq2, rew2)
    assert jnp.allclose(out2, ref2, atol=1e-4, rtol=1e-3), (out2, ref2)

    # --- Test 3: divisible shape with default block selection (2 B-tiles). ---
    B3, T3 = 32, 384
    inp3 = jax.random.normal(keys[6], (B3, T3), dtype=jnp.float32)
    seq3 = jax.random.randint(keys[7], (B3, T3), 0, 3, dtype=jnp.int32)
    rew3 = jax.random.normal(keys[8], (B3, T3), dtype=jnp.float32)

    out3 = reward_criterion(inp3, seq3, rew3)
    jax.block_until_ready(out3)
    ref3 = _reference(inp3, seq3, rew3)
    assert jnp.allclose(out3, ref3, atol=1e-5, rtol=1e-5), (out3, ref3)

    print("KERNEL_OK")
</pallas_src>

<mosaic_0001>
module attributes {stable_mosaic.version = 11 : i64} {
  func.func @_reward_criterion_kernel(%arg0: i32, %arg1: i32, %arg2: memref<8x128xf32, #tpu.memory_space<vmem>>, %arg3: memref<8x128xi32, #tpu.memory_space<vmem>>, %arg4: memref<8x128xf32, #tpu.memory_space<vmem>>, %arg5: memref<1x8x128xf32, #tpu.memory_space<vmem>>, %arg6: memref<1x8x128xf32, #tpu.memory_space<vmem>>, %arg7: memref<8x128xf32, #tpu.memory_space<vmem>>, %arg8: memref<8x128xf32, #tpu.memory_space<vmem>>) attributes {dimension_semantics = [#tpu.dimension_semantics<parallel>, #tpu.dimension_semantics<arbitrary>], iteration_bounds = array<i64: 1, 1>, scalar_prefetch = 0 : i64, scratch_operands = 2 : i64, tpu.core_type = #tpu.core_type<tc>, window_params = [{transform_indices = @transform_0, window_bounds = array<i64: 8, 128>}, {transform_indices = @transform_1, window_bounds = array<i64: 8, 128>}, {transform_indices = @transform_2, window_bounds = array<i64: 8, 128>}, {transform_indices = @transform_3, window_bounds = array<i64: 1, 8, 128>}, {transform_indices = @transform_4, window_bounds = array<i64: 1, 8, 128>}]} {
    %c0_i32 = arith.constant 0 : i32
    %0 = arith.cmpi eq, %arg1, %c0_i32 : i32
    %1 = arith.extui %0 : i1 to i32
    %c0_i32_0 = arith.constant 0 : i32
    %2 = arith.cmpi ne, %1, %c0_i32_0 : i32
    scf.if %2 {
      %cst = arith.constant 0.000000e+00 : f32
      %17 = vector.broadcast %cst : f32 to vector<8x128xf32>
      %c0_11 = arith.constant 0 : index
      %c0_12 = arith.constant 0 : index
      %18 = vector.load %arg7[%c0_11, %c0_12] : memref<8x128xf32, #tpu.memory_space<vmem>>, vector<8x128xf32>
      tpu.vector_store %arg7[%c0_11, %c0_12], %17 {strides = array<i32>} : memref<8x128xf32, #tpu.memory_space<vmem>>, vector<8x128xf32>,
      %cst_13 = arith.constant 0.000000e+00 : f32
      %19 = vector.broadcast %cst_13 : f32 to vector<8x128xf32>
      %c0_14 = arith.constant 0 : index
      %c0_15 = arith.constant 0 : index
      %20 = vector.load %arg8[%c0_14, %c0_15] : memref<8x128xf32, #tpu.memory_space<vmem>>, vector<8x128xf32>
      tpu.vector_store %arg8[%c0_14, %c0_15], %19 {strides = array<i32>} : memref<8x128xf32, #tpu.memory_space<vmem>>, vector<8x128xf32>,
    } else {
    }
    %c0 = arith.constant 0 : index
    %c0_1 = arith.constant 0 : index
    %3 = vector.load %arg2[%c0, %c0_1] : memref<8x128xf32, #tpu.memory_space<vmem>>, vector<8x128xf32>
    %c0_2 = arith.constant 0 : index
    %c0_3 = arith.constant 0 : index
    %4 = vector.load %arg4[%c0_2, %c0_3] : memref<8x128xf32, #tpu.memory_space<vmem>>, vector<8x128xf32>
    %c0_4 = arith.constant 0 : index
    %c0_5 = arith.constant 0 : index
    %5 = vector.load %arg3[%c0_4, %c0_5] : memref<8x128xi32, #tpu.memory_space<vmem>>, vector<8x128xi32>
    %c0_i32_6 = arith.constant 0 : i32
    %6 = vector.broadcast %c0_i32_6 : i32 to vector<8x128xi32>
    %7 = arith.cmpi sgt, %5, %6 : vector<8x128xi32>
    %8 = arith.extui %7 : vector<8x128xi1> to vector<8x128xi32>
    %9 = arith.sitofp %8 : vector<8x128xi32> to vector<8x128xf32>
    %10 = arith.mulf %3, %4 : vector<8x128xf32>
    %c0_i32_7 = arith.constant 0 : i32
    %11 = arith.cmpi slt, %arg1, %c0_i32_7 : i32
    %12 = arith.extui %11 : i1 to i32
    %c0_i32_8 = arith.constant 0 : i32
    %13 = arith.cmpi ne, %12, %c0_i32_8 : i32
    scf.if %13 {
      %c0_11 = arith.constant 0 : index
      %c0_12 = arith.constant 0 : index
      %17 = vector.load %arg7[%c0_11, %c0_12] : memref<8x128xf32, #tpu.memory_space<vmem>>, vector<8x128xf32>
      %18 = arith.addf %17, %10 : vector<8x128xf32>
      %c0_13 = arith.constant 0 : index
      %c0_14 = arith.constant 0 : index
      %19 = vector.load %arg7[%c0_13, %c0_14] : memref<8x128xf32, #tpu.memory_space<vmem>>, vector<8x128xf32>
      tpu.vector_store %arg7[%c0_13, %c0_14], %18 {strides = array<i32>} : memref<8x128xf32, #tpu.memory_space<vmem>>, vector<8x128xf32>,
      %c0_15 = arith.constant 0 : index
      %c0_16 = arith.constant 0 : index
      %20 = vector.load %arg8[%c0_15, %c0_16] : memref<8x128xf32, #tpu.memory_space<vmem>>, vector<8x128xf32>
      %21 = arith.addf %20, %9 : vector<8x128xf32>
      %c0_17 = arith.constant 0 : index
      %c0_18 = arith.constant 0 : index
      %22 = vector.load %arg8[%c0_17, %c0_18] : memref<8x128xf32, #tpu.memory_space<vmem>>, vector<8x128xf32>
      tpu.vector_store %arg8[%c0_17, %c0_18], %21 {strides = array<i32>} : memref<8x128xf32, #tpu.memory_space<vmem>>, vector<8x128xf32>,
    } else {
    }
    %c0_i32_9 = arith.constant 0 : i32
    %14 = arith.cmpi eq, %arg1, %c0_i32_9 : i32
    %15 = arith.extui %14 : i1 to i32
    %c0_i32_10 = arith.constant 0 : i32
    %16 = arith.cmpi ne, %15, %c0_i32_10 : i32
    scf.if %16 {
      %c128_i32 = arith.constant 128 : i32
      %17 = arith.muli %arg1, %c128_i32 : i32
      %18 = tpu.iota {dimensions = array<i32: 1>} : vector<8x128xi32>
      %19 = vector.broadcast %17 : i32 to vector<8x128xi32>
      %20 = arith.addi %19, %18 : vector<8x128xi32>
      %c7_i32 = arith.constant 7 : i32
      %21 = vector.broadcast %c7_i32 : i32 to vector<8x128xi32>
      %22 = arith.cmpi slt, %20, %21 : vector<8x128xi32>
      %cst = arith.constant 0.000000e+00 : f32
      %23 = vector.broadcast %cst : f32 to vector<8x128xf32>
      %24 = arith.select %22, %9, %23 : vector<8x128xi1>, vector<8x128xf32>
      %c8_i32 = arith.constant 8 : i32
      %25 = vector.broadcast %c8_i32 : i32 to vector<8x128xi32>
      %26 = arith.cmpi slt, %20, %25 : vector<8x128xi32>
      %cst_11 = arith.constant 0.000000e+00 : f32
      %27 = vector.broadcast %cst_11 : f32 to vector<8x128xf32>
      %28 = arith.select %26, %10, %27 : vector<8x128xi1>, vector<8x128xf32>
      %c0_12 = arith.constant 0 : index
      %c0_13 = arith.constant 0 : index
      %29 = vector.load %arg7[%c0_12, %c0_13] : memref<8x128xf32, #tpu.memory_space<vmem>>, vector<8x128xf32>
      %30 = arith.addf %29, %28 : vector<8x128xf32>
      %c0_14 = arith.constant 0 : index
      %c0_15 = arith.constant 0 : index
      %31 = vector.load %arg8[%c0_14, %c0_15] : memref<8x128xf32, #tpu.memory_space<vmem>>, vector<8x128xf32>
      %32 = arith.addf %31, %24 : vector<8x128xf32>
      %c8_i32_16 = arith.constant 8 : i32
      %33 = arith.muli %arg0, %c8_i32_16 : i32
      %34 = tpu.iota {dimensions = array<i32: 0>} : vector<8x128xi32>
      %35 = vector.broadcast %33 : i32 to vector<8x128xi32>
      %36 = arith.addi %35, %34 : vector<8x128xi32>
      %c2_i32 = arith.constant 2 : i32
      %37 = vector.broadcast %c2_i32 : i32 to vector<8x128xi32>
      %38 = arith.cmpi slt, %36, %37 : vector<8x128xi32>
      %cst_17 = arith.constant 0.000000e+00 : f32
      %39 = vector.broadcast %cst_17 : f32 to vector<8x128xf32>
      %40 = arith.select %38, %30, %39 : vector<8x128xi1>, vector<8x128xf32>
      %cst_18 = arith.constant 0.000000e+00 : f32
      %41 = vector.broadcast %cst_18 : f32 to vector<8x128xf32>
      %42 = arith.select %38, %32, %41 : vector<8x128xi1>, vector<8x128xf32>
      %c8_i32_19 = arith.constant 8 : i32
      %43 = arith.muli %arg0, %c8_i32_19 : i32
      %c2_i32_20 = arith.constant 2 : i32
      %44 = arith.subi %c2_i32_20, %43 : i32
      %c8_i32_21 = arith.constant 8 : i32
      %45 = arith.minsi %44, %c8_i32_21 : i32
      %46 = arith.sitofp %45 : i32 to f32
      %47 = vector.shape_cast %40 : vector<8x128xf32> to vector<1x8x128xf32>
      %cst_22 = arith.constant dense<0.000000e+00> : vector<1xf32>
      %48 = vector.multi_reduction <add>, %47, %cst_22 [1, 2] : vector<1x8x128xf32> to vector<1xf32>
      %49 = vector.shape_cast %48 : vector<1xf32> to vector<1x1x1xf32>
      %50 = vector.extract %49[0, 0, 0] : f32 from vector<1x1x1xf32>
      %cst_23 = arith.constant 0.000000e+00 : f32
      %51 = arith.subf %cst_23, %50 : f32
      %52 = vector.shape_cast %42 : vector<8x128xf32> to vector<1x8x128xf32>
      %cst_24 = arith.constant dense<0.000000e+00> : vector<1xf32>
      %53 = vector.multi_reduction <add>, %52, %cst_24 [1, 2] : vector<1x8x128xf32> to vector<1xf32>
      %54 = vector.shape_cast %53 : vector<1xf32> to vector<1x1x1xf32>
      %55 = vector.extract %54[0, 0, 0] : f32 from vector<1x1x1xf32>
      %56 = arith.addf %55, %46 : f32
      %57 = vector.broadcast %51 : f32 to vector<1x8x128xf32>
      %c0_25 = arith.constant 0 : index
      %c0_26 = arith.constant 0 : index
      %c0_27 = arith.constant 0 : index
      %58 = vector.load %arg5[%c0_25, %c0_26, %c0_27] : memref<1x8x128xf32, #tpu.memory_space<vmem>>, vector<1x8x128xf32>
      tpu.vector_store %arg5[%c0_25, %c0_26, %c0_27], %57 {strides = array<i32>} : memref<1x8x128xf32, #tpu.memory_space<vmem>>, vector<1x8x128xf32>,
      %59 = vector.broadcast %56 : f32 to vector<1x8x128xf32>
      %c0_28 = arith.constant 0 : index
      %c0_29 = arith.constant 0 : index
      %c0_30 = arith.constant 0 : index
      %60 = vector.load %arg6[%c0_28, %c0_29, %c0_30] : memref<1x8x128xf32, #tpu.memory_space<vmem>>, vector<1x8x128xf32>
      tpu.vector_store %arg6[%c0_28, %c0_29, %c0_30], %59 {strides = array<i32>} : memref<1x8x128xf32, #tpu.memory_space<vmem>>, vector<1x8x128xf32>,
    } else {
    }
    return
  }
  func.func @transform_0(%arg0: i32, %arg1: i32) -> (i32, i32) {
    %c0_i32 = arith.constant 0 : i32
    return %arg0, %arg1 : i32, i32
  }
  func.func @transform_1(%arg0: i32, %arg1: i32) -> (i32, i32) {
    %c0_i32 = arith.constant 0 : i32
    return %arg0, %arg1 : i32, i32
  }
  func.func @transform_2(%arg0: i32, %arg1: i32) -> (i32, i32) {
    %c0_i32 = arith.constant 0 : i32
    return %arg0, %arg1 : i32, i32
  }
  func.func @transform_3(%arg0: i32, %arg1: i32) -> (i32, i32, i32) {
    %c0_i32 = arith.constant 0 : i32
    %c0_i32_0 = arith.constant 0 : i32
    %c0_i32_1 = arith.constant 0 : i32
    return %arg0, %c0_i32, %c0_i32_0 : i32, i32, i32
  }
  func.func @transform_4(%arg0: i32, %arg1: i32) -> (i32, i32, i32) {
    %c0_i32 = arith.constant 0 : i32
    %c0_i32_0 = arith.constant 0 : i32
    %c0_i32_1 = arith.constant 0 : i32
    return %arg0, %c0_i32, %c0_i32_0 : i32, i32, i32
  }
}

</mosaic_0001>

<bundles_post_ra>
// kernel: tpu_custom_call.1
= control target key start
LH: loop header
LB: loop body
LE: loop exit
PB: predicated region body
PF: predicated region fallthrough
CT: control target
= control target key end

     0   :  { %10 = vsyncpa [#allocation5], 0  ;;  %s298_s0 = inlined_call_operand.hbm [shape: f32[2,8], index: 0, kind: input, shape index: {}]   ;;  %s299_s1 = inlined_call_operand.hbm [shape: s32[2,8], index: 1, kind: input, shape index: {}]   ;;  %s300_s2 = inlined_call_operand.vmem [shape: f32[2,8], index: 2, kind: input, shape index: {}]   ;;  %s301_s3 = inlined_call_operand.hbm [shape: f32[1,8,128], index: 3, kind: output, shape index: {0}]   ;;  %s302_s4 = inlined_call_operand.hbm [shape: f32[1,8,128], index: 4, kind: output, shape index: {1}]  }
   0x1   :  { %11 = vsyncpa [#allocation8], 0 }
   0x2   :  { %12 = vsyncpa [#allocation6], 0 }
   0x3   :  { %13 = vsyncpa [#allocation11], 0 }
   0x4   :  { %18 = vsyncadd [#allocation5], 96  ;;  %s251_s15 = smov [#allocation4]  }
   0x5   :  { %s19_s16 = sshll.u32 %s251_s15, 4  ;;  %s20_s16 = int_to_ptr.vmem [resolvable:$true] %s19_s16 }
   0x6   :  { %s171_s17 = scalar_lea.vmem %s20_s16, 32  ;;  %s175_s18 = scalar_lea.vmem %s20_s16, 128 }
   0x7   :  { %p172_p0 = scmp.ne.s32.totalorder %s20_s16, %s171_s17  ;;  %p176_p1 = scmp.lt.s32.totalorder %s20_s16, %s20_s16 }
   0x8   :  { %p177_p2 = scmp.lt.s32.totalorder %s175_s18, %s171_s17 }
   0xa   :  { %p178_p3 = por %p177_p2, %p176_p1 }
   0xc   :  { %p179_p4 = pnand %p178_p3, %p172_p0 }
   0xe   :  { %182 = shalt.err (!%p179_p4)
}
   0xf   :  { %s252_s19 = smov 32   ;;  %s253_s20 = smov 2  }
  0x10   :  { %25 = dma.hbm_to_vmem [thread:$0]  %s298_s0, 32, %s20_s16, [#allocation5], %s252_s19, %s252_s19, %s253_s20  }
  0x11   :  { %30 = vsyncadd [#allocation8], 96  ;;  %s254_s23 = smov [#allocation7]  }
  0x12   :  { %s31_s24 = sshll.u32 %s254_s23, 4  ;;  %s32_s24 = int_to_ptr.vmem [resolvable:$true] %s31_s24 }
  0x13   :  { %s191_s25 = scalar_lea.vmem %s32_s24, 32  ;;  %s195_s26 = scalar_lea.vmem %s32_s24, 128 }
  0x14   :  { %p192_p5 = scmp.ne.s32.totalorder %s32_s24, %s191_s25  ;;  %p196_p6 = scmp.lt.s32.totalorder %s32_s24, %s32_s24 }
  0x15   :  { %p197_p7 = scmp.lt.s32.totalorder %s195_s26, %s191_s25 }
  0x17   :  { %p198_p8 = por %p197_p7, %p196_p6 }
  0x19   :  { %p199_p9 = pnand %p198_p8, %p192_p5 }
  0x1b   :  { %202 = shalt.err (!%p199_p9)
}
  0x1c   :  { %37 = dma.hbm_to_vmem [thread:$0]  %s299_s1, 32, %s32_s24, [#allocation8], %s252_s19, %s252_s19, %s253_s20  }
  0x1d   :  { %243 = dma.done.wait [#allocation5], 128  }
  0x1e   :  { %244 = vsyncadd [#allocation5], 4294967168 }
  0x1f   :  { %245 = dma.done.wait [#allocation8], 128  }
  0x20   :  { %246 = vsyncadd [#allocation8], 4294967168  ;;  %v73_v0 = vlaneseq  ;;  %v52_v3 = vld [vmem:[#allocation4] sm:$0xff]  ;;  %v54_v5 = vld [vmem:[#allocation7] sm:$0xff]  ;;  %v255_v7 = vmov 0.0   ;;  %s257_s6 = smov [#allocation10]  }
  0x21   :  { %v53_v4 = vld [vmem:[%s300_s2] sm:$0xff]  ;;  %vm55_vm3 = vcmp.gt.s32.totalorder %v54_v5, 0  ;;  %s256_s2 = smov [#allocation9]   ;;  %s137_s7 = sshll.u32 %s257_s6, 4  ;;  %s138_s7 = int_to_ptr.vmem [resolvable:$true] %s137_s7 }
  0x22   :  { %v74_v1 = vand.u32 127, %v73_v0  ;;  %v87_v2 = vshrl.u32 %v73_v0, 7  ;;  %v58_v6 = vmul.f32 %v53_v4, %v52_v3  ;;  %v151_v8 = vsel %vm55_vm3, 1.0, %v255_v7  ;;  %s127_s30 = sshll.u32 %s256_s2, 4  ;;  %s128_s30 = int_to_ptr.vmem [resolvable:$true] %s127_s30 }
  0x23   :  { %s203_s10 = scalar_lea.vmem %s128_s30, 128  ;;  %p208_p11 = scmp.lt.s32.totalorder %s128_s30, %s128_s30 }
  0x24   :  { %vm79_vm0 = vcmp.lt.s32.totalorder %v74_v1, 8  ;;  %vm77_vm1 = vcmp.lt.s32.totalorder %v74_v1, 7  ;;  %vm90_vm2 = vcmp.lt.s32.totalorder %v87_v2, 2  ;;  %p204_p10 = scmp.ne.s32.totalorder %s128_s30, %s203_s10  ;;  %p209_p12 = scmp.lt.s32.totalorder %s203_s10, %s203_s10 }
  0x25   :  { %v80_v9 = vsel %vm79_vm0, %v58_v6, 0.0  ;;  %v78_v10 = vsel %vm77_vm1, %v151_v8, 0.0 }
  0x26   :  { %v91_v11 = vsel %vm90_vm2, %v80_v9, 0.0  ;;  %v92_v12 = vsel %vm90_vm2, %v78_v10, 0.0  ;;  %p210_p13 = por %p209_p12, %p208_p11 }
  0x27   :  { %97 = vadd.xlane.f32.xlu0 %v91_v11 }
  0x28   :  { %p211_p0 = pnand %p210_p13, %p204_p10 }
  0x2b   :  { %107 = vadd.xlane.f32.xlu0 %v92_v12 }
  0xb0   :  { %v98_v13 = vpop.xlane.xlu0 %97 }
  0xb1   :  { %v99_v14 = vrot.slane %v98_v13, 4 }
  0xb3   :  { %v100_v15 = vadd.f32 %v99_v14, %v98_v13 }
  0xb4   :  { %v108_v16 = vpop.xlane.xlu0 %107 }
  0xb5   :  { %v101_v17 = vrot.slane %v100_v15, 2  ;;  %v109_v18 = vrot.slane %v108_v16, 4 }
  0xb7   :  { %v110_v19 = vadd.f32 %v109_v18, %v108_v16  ;;  %v102_v20 = vadd.f32 %v101_v17, %v100_v15 }
  0xb9   :  { %v111_v21 = vrot.slane %v110_v19, 2  ;;  %v103_v22 = vrot.slane %v102_v20, 1 }
  0xbb   :  { %v112_v23 = vadd.f32 %v111_v21, %v110_v19  ;;  %v104_v24 = vadd.f32 %v103_v22, %v102_v20 }
  0xbd   :  { %152 = vpush %v104_v24  ;;  %v113_v25 = vrot.slane %v112_v23, 1 }
  0xbf   :  { %v114_v26 = vadd.f32 %v113_v25, %v112_v23 }
  0xc1   :  { %154 = vpush %v114_v26 }
  0xee   :  { %s153_s1 = spop %152 }
  0xef   :  { %s106_s5 = ssub.f32 0.0, %s153_s1 }
  0xf1   :  { %v117_v27 = vstv %s106_s5 }
  0xf2   :  { %118 = vst [vmem:[#allocation9] sm:$0xff] %v117_v27  ;;  %s155_s8 = spop %154 }
  0xf3   :  { %s116_s9 = sadd.f32 2.0, %s155_s8 }
  0xf4   :  { %214 = shalt.err (!%p211_p0)
}
  0xf5   :  { %130 = dma.vmem_to_hbm [thread:$0]  %s128_s30, 128, %s301_s3, [#allocation6]   ;;  %v119_v28 = vstv %s116_s9 }
  0xf6   :  { %120 = vst [vmem:[#allocation10] sm:$0xff] %v119_v28  ;;  %s223_s13 = scalar_lea.vmem %s138_s7, 128  ;;  %p228_p2 = scmp.lt.s32.totalorder %s138_s7, %s138_s7 }
  0xf7   :  { %p224_p1 = scmp.ne.s32.totalorder %s138_s7, %s223_s13  ;;  %p229_p3 = scmp.lt.s32.totalorder %s223_s13, %s223_s13 }
  0xf9   :  { %p230_p4 = por %p229_p3, %p228_p2 }
  0xfb   :  { %p231_p5 = pnand %p230_p4, %p224_p1 }
  0xfd   :  { %234 = shalt.err (!%p231_p5)
}
  0xfe   :  { %140 = dma.vmem_to_hbm [thread:$0]  %s138_s7, 128, %s302_s4, [#allocation11]  }
  0xff   :  { %247 = dma.done.wait [#allocation6], 128  }
 0x100   :  { %248 = vsyncadd [#allocation6], 4294967168 }
 0x101   :  { %249 = dma.done.wait [#allocation11], 128  }
 0x102   :  { %250 = vsyncadd [#allocation11], 4294967168 }
 0x103   :  { %147 = vsyncpa [#allocation5], 1 }
 0x104   :  { %148 = vsyncpa [#allocation8], 1 }
 0x105   :  { %149 = vsyncpa [#allocation6], 1 }
 0x106   :  { %150 = vsyncpa [#allocation11], 1 }

</bundles_post_ra>
